<compile_context>
chip_gen: v7x
topology: tpu7x:2x2x1
jax: 0.10.0
libtpu: 0.0.40
codegen_flags: <defaults>
</compile_context>

<pallas_src>
import functools

import jax
import jax.numpy as jnp
from jax import lax
from jax.experimental import pallas as pl
from jax.experimental.pallas import tpu as pltpu


def _round_up(x, m):
    return (x + m - 1) // m * m


def rvq_kernel(x_ref, embT_ref, emb_ref, esq_ref,
               xq_ref, loss_ref, idx_ref, logit_ref,
               res_ref, *, n_valid, resident):
    i = pl.program_id(0)   # token-tile index ("parallel")
    q = pl.program_id(1)   # quantizer layer ("arbitrary", MUST stay innermost/sequential)

    # Initialize the per-tile carries at the first layer of each tile.
    @pl.when(q == 0)
    def _():
        res_ref[...] = x_ref[...].astype(jnp.float32)
        xq_ref[...] = jnp.zeros_like(xq_ref)
        idx_ref[...] = jnp.zeros_like(idx_ref)
        loss_ref[...] = jnp.zeros_like(loss_ref)

    # Resident codebooks: index layer q inside the kernel (no per-step codebook DMA).
    li = q if resident else 0
    embT = embT_ref[li]                   # (E, n_e_pad)  pre-transposed, pre-scaled by -2
    emb = emb_ref[li]                     # (n_e_pad, E)  codebook (for the MXU gather)
    esq = esq_ref[li]                     # (1, n_e_pad)  precomputed ||E||^2 (+sentinel)

    r = res_ref[...]                      # (TN, E) f32 residual
    tn, _ = r.shape
    n_e_pad = embT.shape[1]

    # Squared L2 distances: d = ||r||^2 + ||E||^2 + r @ (-2 E^T)   (MXU, (M,K)x(K,N))
    r_sq = jnp.sum(r * r, axis=1, keepdims=True)                          # (TN, 1)
    cross = jnp.dot(r, embT, preferred_element_type=jnp.float32)          # (TN, n_e_pad)
    d = r_sq + esq + cross                                                # (TN, n_e_pad)

    # First-occurrence argmin (padded codes carry a huge ||E||^2 and never win).
    dmin = jnp.min(d, axis=1, keepdims=True)                              # (TN, 1)
    col = lax.broadcasted_iota(jnp.int32, d.shape, 1)                     # (TN, n_e_pad)
    idx = jnp.min(jnp.where(d == dmin, col, n_e_pad), axis=1,
                  keepdims=True)                                          # (TN, 1) int32
    one_hot = (col == idx).astype(jnp.float32)                            # (TN, n_e_pad)

    # Embedding lookup as one_hot @ codebook (MXU gather).
    x_res = jnp.dot(one_hot, emb, preferred_element_type=jnp.float32)     # (TN, E)

    # Partial SSE for this (tile, layer); padded rows masked out.
    diff = x_res - r
    row_sse = jnp.sum(diff * diff, axis=1, keepdims=True)                 # (TN, 1)
    rows = lax.broadcasted_iota(jnp.int32, (tn, 1), 0) + i * tn
    row_sse = jnp.where(rows < n_valid, row_sse, 0.0)
    sse = jnp.sum(row_sse, axis=0, keepdims=True).reshape(1, 1, 1)        # (1, 1, 1)

    # Update carries (resident across q; written back to HBM once per tile).
    xq_ref[...] = xq_ref[...] + x_res
    res_ref[...] = r - x_res

    # Per-layer index into lane q of the resident (TN, Q) index block.
    qcol = lax.broadcasted_iota(jnp.int32, idx_ref.shape, 1)              # (TN, Q)
    idx_ref[...] = jnp.where(qcol == q, idx, idx_ref[...])

    # Per-layer SSE into lane q of the resident (1, 1, Q) loss block.
    lcol = lax.broadcasted_iota(jnp.int32, loss_ref.shape, 2)             # (1, 1, Q)
    loss_ref[...] = jnp.where(lcol == q, sse, loss_ref[...])

    # Lane-dense logits tile (n_e_pad % 128 == 0), layout (token, layer*code).
    logit_ref[...] = d


def residual_vector_quantizer(x, codebooks, beta, *,
                              max_tile=512, vmem_budget=40 << 20):
    """x: (B, L, E) float32; codebooks: (Q, n_e, E) float32 (same n_e per layer)."""
    B, L, E = x.shape
    Q, n_e, E2 = codebooks.shape
    assert E == E2
    N = B * L

    latent = x.reshape(N, E).astype(jnp.float32)
    cbs = codebooks.astype(jnp.float32)

    # --- padding / tiling choices -------------------------------------------------
    n_e_pad = _round_up(n_e, 128)                 # lane-dense logits / one-hot math

    # Codebooks resident in VMEM unless they would eat most of the budget.
    cb_resident_bytes = Q * n_e_pad * (2 * E + 1) * 4
    resident = cb_resident_bytes <= (vmem_budget // 3)

    def vmem_estimate(tn):
        est = cb_resident_bytes if resident else 2 * n_e_pad * (2 * E + 1) * 4
        est += 2 * tn * E * 4              # latent in (double-buffered)
        est += 2 * tn * E * 4              # x_q out
        est += 2 * tn * n_e_pad * 4        # logits out (the big one)
        est += 2 * tn * 128 * 4            # idx out (lane-padded, conservative)
        est += tn * E * 4                  # residual scratch
        est += 2 << 20                     # loss block + misc headroom
        return est

    if N <= max_tile:
        TN = _round_up(N, 8)
    else:
        TN = max_tile
    # Shrink the tile if the per-step VMEM estimate blows the budget (v7x: 64 MiB phys).
    while TN > 8 and vmem_estimate(TN) > vmem_budget:
        TN = max(8, _round_up(TN // 2, 8))

    N_pad = _round_up(N, TN)
    T = N_pad // TN

    if N_pad != N:
        latent = jnp.pad(latent, ((0, N_pad - N), (0, 0)))

    # Pad codebooks along the code axis; padded rows are zero vectors whose ||E||^2
    # is replaced by a large sentinel so they never win the argmin. Fold -2 into the
    # transposed codebook (exact power-of-two scale, no effect on tie-breaking).
    emb = jnp.pad(cbs, ((0, 0), (0, n_e_pad - n_e), (0, 0)))      # (Q, n_e_pad, E)
    embT_m2 = jnp.transpose(emb, (0, 2, 1)) * jnp.float32(-2.0)   # (Q, E, n_e_pad)
    e_sq = jnp.sum(emb * emb, axis=-1)[:, None, :]                # (Q, 1, n_e_pad)
    if n_e_pad != n_e:
        pad_mask = (jnp.arange(n_e_pad) >= n_e)[None, None, :]
        e_sq = jnp.where(pad_mask, jnp.float32(1e30), e_sq)

    kernel = functools.partial(rvq_kernel, n_valid=N, resident=resident)

    out_shape = (
        jax.ShapeDtypeStruct((N_pad, E), jnp.float32),            # x_q (flat, padded)
        jax.ShapeDtypeStruct((T, 1, Q), jnp.float32),             # per-(tile, layer) SSE
        jax.ShapeDtypeStruct((N_pad, Q), jnp.int32),              # argmin indices
        jax.ShapeDtypeStruct((N_pad, Q * n_e_pad), jnp.float32),  # logits, (token, layer*code)
    )

    if resident:
        cb_specs = [
            pl.BlockSpec((Q, E, n_e_pad), lambda i, q: (0, 0, 0)),   # embT (-2x), resident
            pl.BlockSpec((Q, n_e_pad, E), lambda i, q: (0, 0, 0)),   # emb, resident
            pl.BlockSpec((Q, 1, n_e_pad), lambda i, q: (0, 0, 0)),   # ||E||^2, resident
        ]
    else:
        cb_specs = [
            pl.BlockSpec((1, E, n_e_pad), lambda i, q: (q, 0, 0)),
            pl.BlockSpec((1, n_e_pad, E), lambda i, q: (q, 0, 0)),
            pl.BlockSpec((1, 1, n_e_pad), lambda i, q: (q, 0, 0)),
        ]

    grid_spec = pltpu.PrefetchScalarGridSpec(
        num_scalar_prefetch=0,
        grid=(T, Q),
        in_specs=[pl.BlockSpec((TN, E), lambda i, q: (i, 0))] + cb_specs,
        out_specs=[
            pl.BlockSpec((TN, E), lambda i, q: (i, 0)),            # x_q (revisited over q)
            pl.BlockSpec((1, 1, Q), lambda i, q: (i, 0, 0)),       # SSE (revisited over q)
            pl.BlockSpec((TN, Q), lambda i, q: (i, 0)),            # indices (revisited over q)
            pl.BlockSpec((TN, n_e_pad), lambda i, q: (i, q)),      # logits (lane-dense)
        ],
        scratch_shapes=[pltpu.VMEM((TN, E), jnp.float32)],         # residual carry
    )

    vmem_limit = int(min(max(vmem_estimate(TN) + (8 << 20), 32 << 20), 48 << 20))

    x_q_flat, sse, idx_out, logits_flat = pl.pallas_call(
        kernel,
        out_shape=out_shape,
        grid_spec=grid_spec,
        compiler_params=pltpu.CompilerParams(
            # Token tiles are independent -> parallel (2 TCs on v7x); the residual
            # chain over quantizers is sequential -> arbitrary. Do NOT reorder the
            # grid or mark q parallel: the residual scratch relies on q=0..Q-1
            # executing consecutively per tile.
            dimension_semantics=("parallel", "arbitrary"),
            vmem_limit_bytes=vmem_limit),
    )(latent, embT_m2, emb, e_sq)

    # --- wrapper post-processing (no transpose / no argmin over logits) -----------
    x_q = x_q_flat[:N].reshape(B, L, E)

    sse_per_q = jnp.sum(sse[:, 0, :], axis=0)                              # (Q,)
    loss_per_q = sse_per_q * ((1.0 + beta) / (N * E))
    mean_loss = jnp.mean(loss_per_q)

    all_logits = logits_flat.reshape(N_pad, Q, n_e_pad)[:N, :, :n_e]       # (N, Q, n_e)
    indices_flat = idx_out[:N, :]                                          # (N, Q) int32
    all_indices = indices_flat.reshape(B, L, Q)
    all_one_hots = jax.nn.one_hot(indices_flat, n_e, dtype=jnp.float32)    # (N, Q, n_e)

    return x_q, mean_loss, all_indices, all_one_hots, all_logits


def _reference(x, codebooks, beta):
    """Pure-JAX reference of the PyTorch forward (dist='l2')."""
    B, L, E = x.shape
    Q, n_e, _ = codebooks.shape
    latent = x.reshape(-1, E)
    residual = latent
    x_q = jnp.zeros_like(latent)
    losses, idxs, ohs, ds = [], [], [], []
    for qi in range(Q):
        emb = codebooks[qi]
        d = (jnp.sum(residual ** 2, 1, keepdims=True)
             + jnp.sum(emb ** 2, 1)[None, :]
             - 2.0 * residual @ emb.T)
        idx = jnp.argmin(d, axis=-1)
        oh = jax.nn.one_hot(idx, n_e, dtype=jnp.float32)
        x_res = emb[idx]
        loss = (1.0 + beta) * jnp.mean((x_res - residual) ** 2)
        residual = residual - x_res
        x_q = x_q + x_res
        losses.append(loss); idxs.append(idx); ohs.append(oh); ds.append(d)
    return (x_q.reshape(B, L, E),
            jnp.mean(jnp.stack(losses)),
            jnp.stack(idxs, -1).reshape(B, L, Q),
            jnp.stack(ohs, 1),
            jnp.stack(ds, 1))


if __name__ == "__main__":
    # config: num_emb_list=[16,16,16], e_dim=32, beta=0.25, dist='l2', vq_type='vq'
    B, L, E = 2, 8, 32
    Q, n_e = 3, 16
    beta = 0.25

    key = jax.random.PRNGKey(0)
    kx, kc = jax.random.split(key)
    x = jax.random.normal(kx, (B, L, E), dtype=jnp.float32)
    # nn.Embedding(n_e, e_dim).weight.uniform_(-1/n_e, 1/n_e), one per quantizer.
    codebooks = jax.random.uniform(kc, (Q, n_e, E), dtype=jnp.float32,
                                   minval=-1.0 / n_e, maxval=1.0 / n_e)

    outs = residual_vector_quantizer(x, codebooks, beta)
    outs = jax.block_until_ready(outs)
    x_q, mean_loss, all_indices, all_one_hots, all_logits = outs

    # Sanity check against a pure-JAX reference of the torch forward.
    r_xq, r_loss, r_idx, r_oh, r_logit = _reference(x, codebooks, beta)
    assert x_q.shape == (B, L, E) and all_indices.shape == (B, L, Q)
    assert all_one_hots.shape == (B * L, Q, n_e) and all_logits.shape == (B * L, Q, n_e)
    assert jnp.allclose(x_q, r_xq, atol=1e-5)
    assert jnp.allclose(mean_loss, r_loss, atol=1e-5)
    assert jnp.array_equal(all_indices.astype(jnp.int32), r_idx.astype(jnp.int32))
    assert jnp.allclose(all_one_hots, r_oh, atol=1e-6)
    assert jnp.allclose(all_logits, r_logit, atol=1e-4)

    print("KERNEL_OK")
</pallas_src>

<mosaic_0001>
module attributes {stable_mosaic.version = 11 : i64} {
  func.func @rvq_kernel(%arg0: i32, %arg1: i32, %arg2: memref<16x32xf32, #tpu.memory_space<vmem>>, %arg3: memref<3x32x128xf32, #tpu.memory_space<vmem>>, %arg4: memref<3x128x32xf32, #tpu.memory_space<vmem>>, %arg5: memref<3x1x128xf32, #tpu.memory_space<vmem>>, %arg6: memref<16x32xf32, #tpu.memory_space<vmem>>, %arg7: memref<1x1x3xf32, #tpu.memory_space<vmem>>, %arg8: memref<16x3xi32, #tpu.memory_space<vmem>>, %arg9: memref<16x128xf32, #tpu.memory_space<vmem>>, %arg10: memref<16x32xf32, #tpu.memory_space<vmem>>) attributes {dimension_semantics = [#tpu.dimension_semantics<parallel>, #tpu.dimension_semantics<arbitrary>], iteration_bounds = array<i64: 1, 3>, scalar_prefetch = 0 : i64, scratch_operands = 1 : i64, tpu.core_type = #tpu.core_type<tc>, window_params = [{transform_indices = @transform_0, window_bounds = array<i64: 16, 32>}, {pipeline_mode = #tpu.pipeline_mode<synchronous>, transform_indices = @transform_1, window_bounds = array<i64: 3, 32, 128>}, {pipeline_mode = #tpu.pipeline_mode<synchronous>, transform_indices = @transform_2, window_bounds = array<i64: 3, 128, 32>}, {pipeline_mode = #tpu.pipeline_mode<synchronous>, transform_indices = @transform_3, window_bounds = array<i64: 3, 1, 128>}, {transform_indices = @transform_4, window_bounds = array<i64: 16, 32>}, {transform_indices = @transform_5, window_bounds = array<i64: 1, 1, 3>}, {transform_indices = @transform_6, window_bounds = array<i64: 16, 3>}, {transform_indices = @transform_7, window_bounds = array<i64: 16, 128>}]} {
    %c0_i32 = arith.constant 0 : i32
    %0 = arith.cmpi eq, %arg1, %c0_i32 : i32
    %1 = arith.extui %0 : i1 to i32
    %c0_i32_0 = arith.constant 0 : i32
    %2 = arith.cmpi ne, %1, %c0_i32_0 : i32
    scf.if %2 {
      %c0_34 = arith.constant 0 : index
      %c0_35 = arith.constant 0 : index
      %72 = vector.load %arg2[%c0_34, %c0_35] : memref<16x32xf32, #tpu.memory_space<vmem>>, vector<16x32xf32>
      %c0_36 = arith.constant 0 : index
      %c0_37 = arith.constant 0 : index
      %73 = vector.load %arg10[%c0_36, %c0_37] : memref<16x32xf32, #tpu.memory_space<vmem>>, vector<16x32xf32>
      tpu.vector_store %arg10[%c0_36, %c0_37], %72 {strides = array<i32>} : memref<16x32xf32, #tpu.memory_space<vmem>>, vector<16x32xf32>,
      %cst_38 = arith.constant 0.000000e+00 : f32
      %74 = vector.broadcast %cst_38 : f32 to vector<16x32xf32>
      %c0_39 = arith.constant 0 : index
      %c0_40 = arith.constant 0 : index
      %75 = vector.load %arg6[%c0_39, %c0_40] : memref<16x32xf32, #tpu.memory_space<vmem>>, vector<16x32xf32>
      tpu.vector_store %arg6[%c0_39, %c0_40], %74 {strides = array<i32>} : memref<16x32xf32, #tpu.memory_space<vmem>>, vector<16x32xf32>,
      %c0_i32_41 = arith.constant 0 : i32
      %76 = vector.broadcast %c0_i32_41 : i32 to vector<16x3xi32>
      %c0_42 = arith.constant 0 : index
      %c0_43 = arith.constant 0 : index
      %77 = vector.load %arg8[%c0_42, %c0_43] : memref<16x3xi32, #tpu.memory_space<vmem>>, vector<16x3xi32>
      tpu.vector_store %arg8[%c0_42, %c0_43], %76 {strides = array<i32>} : memref<16x3xi32, #tpu.memory_space<vmem>>, vector<16x3xi32>,
      %cst_44 = arith.constant 0.000000e+00 : f32
      %78 = vector.broadcast %cst_44 : f32 to vector<1x1x3xf32>
      %c0_45 = arith.constant 0 : index
      %c0_46 = arith.constant 0 : index
      %c0_47 = arith.constant 0 : index
      %79 = vector.load %arg7[%c0_45, %c0_46, %c0_47] : memref<1x1x3xf32, #tpu.memory_space<vmem>>, vector<1x1x3xf32>
      tpu.vector_store %arg7[%c0_45, %c0_46, %c0_47], %78 {strides = array<i32>} : memref<1x1x3xf32, #tpu.memory_space<vmem>>, vector<1x1x3xf32>,
    } else {
    }
    %3 = arith.index_cast %arg1 : i32 to index
    %c0 = arith.constant 0 : index
    %c0_1 = arith.constant 0 : index
    %4 = vector.load %arg3[%3, %c0, %c0_1] : memref<3x32x128xf32, #tpu.memory_space<vmem>>, vector<1x32x128xf32>
    %5 = vector.shape_cast %4 : vector<1x32x128xf32> to vector<32x128xf32>
    %6 = arith.index_cast %arg1 : i32 to index
    %c0_2 = arith.constant 0 : index
    %c0_3 = arith.constant 0 : index
    %7 = vector.load %arg4[%6, %c0_2, %c0_3] : memref<3x128x32xf32, #tpu.memory_space<vmem>>, vector<1x128x32xf32>
    %8 = vector.shape_cast %7 : vector<1x128x32xf32> to vector<128x32xf32>
    %9 = arith.index_cast %arg1 : i32 to index
    %c0_4 = arith.constant 0 : index
    %c0_5 = arith.constant 0 : index
    %10 = vector.load %arg5[%9, %c0_4, %c0_5] : memref<3x1x128xf32, #tpu.memory_space<vmem>>, vector<1x1x128xf32>
    %11 = vector.shape_cast %10 : vector<1x1x128xf32> to vector<1x128xf32>
    %c0_6 = arith.constant 0 : index
    %c0_7 = arith.constant 0 : index
    %12 = vector.load %arg10[%c0_6, %c0_7] : memref<16x32xf32, #tpu.memory_space<vmem>>, vector<16x32xf32>
    %13 = arith.mulf %12, %12 : vector<16x32xf32>
    %cst = arith.constant dense<0.000000e+00> : vector<16xf32>
    %14 = vector.multi_reduction <add>, %13, %cst [1] : vector<16x32xf32> to vector<16xf32>
    %15 = vector.shape_cast %14 : vector<16xf32> to vector<16x1xf32>
    %cst_8 = arith.constant dense<0.000000e+00> : vector<16x128xf32>
    %16 = tpu.matmul %12, %5, %cst_8 {dimension_numbers = #tpu.dot_dimension_numbers<[1], [0], [0], [1], [0, 0, 1, 1], [], []>} : vector<16x32xf32>, vector<32x128xf32>, vector<16x128xf32> -> vector<16x128xf32>
    %17 = vector.broadcast %15 : vector<16x1xf32> to vector<16x128xf32>
    %18 = vector.broadcast %11 : vector<1x128xf32> to vector<16x128xf32>
    %19 = arith.addf %17, %18 : vector<16x128xf32>
    %20 = arith.addf %19, %16 : vector<16x128xf32>
    %cst_9 = arith.constant dense<0x7F800000> : vector<16xf32>
    %21 = vector.multi_reduction <minimumf>, %20, %cst_9 [1] : vector<16x128xf32> to vector<16xf32>
    %22 = vector.shape_cast %21 : vector<16xf32> to vector<16x1xf32>
    %23 = tpu.iota {dimensions = array<i32: 1>} : vector<16x128xi32>
    %24 = vector.broadcast %22 : vector<16x1xf32> to vector<16x128xf32>
    %25 = arith.cmpf oeq, %20, %24 : vector<16x128xf32>
    %c128_i32 = arith.constant 128 : i32
    %26 = vector.broadcast %c128_i32 : i32 to vector<16x128xi32>
    %27 = arith.select %25, %23, %26 : vector<16x128xi1>, vector<16x128xi32>
    %cst_10 = arith.constant dense<2147483647> : vector<16xi32>
    %28 = vector.multi_reduction <minsi>, %27, %cst_10 [1] : vector<16x128xi32> to vector<16xi32>
    %29 = vector.shape_cast %28 : vector<16xi32> to vector<16x1xi32>
    %30 = vector.broadcast %29 : vector<16x1xi32> to vector<16x128xi32>
    %31 = arith.cmpi eq, %23, %30 : vector<16x128xi32>
    %32 = arith.extui %31 : vector<16x128xi1> to vector<16x128xi32>
    %33 = arith.sitofp %32 : vector<16x128xi32> to vector<16x128xf32>
    %cst_11 = arith.constant dense<0.000000e+00> : vector<16x32xf32>
    %34 = tpu.matmul %33, %8, %cst_11 {dimension_numbers = #tpu.dot_dimension_numbers<[1], [0], [0], [1], [0, 0, 1, 1], [], []>} : vector<16x128xf32>, vector<128x32xf32>, vector<16x32xf32> -> vector<16x32xf32>
    %35 = arith.subf %34, %12 : vector<16x32xf32>
    %36 = arith.mulf %35, %35 : vector<16x32xf32>
    %cst_12 = arith.constant dense<0.000000e+00> : vector<16xf32>
    %37 = vector.multi_reduction <add>, %36, %cst_12 [1] : vector<16x32xf32> to vector<16xf32>
    %38 = vector.shape_cast %37 : vector<16xf32> to vector<16x1xf32>
    %39 = tpu.iota {dimensions = array<i32: 0>} : vector<16x1xi32>
    %c16_i32 = arith.constant 16 : i32
    %40 = arith.muli %arg0, %c16_i32 : i32
    %41 = vector.broadcast %40 : i32 to vector<16x1xi32>
    %42 = arith.addi %39, %41 : vector<16x1xi32>
    %c16_i32_13 = arith.constant 16 : i32
    %43 = vector.broadcast %c16_i32_13 : i32 to vector<16x1xi32>
    %44 = arith.cmpi slt, %42, %43 : vector<16x1xi32>
    %cst_14 = arith.constant 0.000000e+00 : f32
    %45 = vector.broadcast %cst_14 : f32 to vector<16x1xf32>
    %46 = arith.select %44, %38, %45 : vector<16x1xi1>, vector<16x1xf32>
    %cst_15 = arith.constant dense<0.000000e+00> : vector<1xf32>
    %47 = vector.multi_reduction <add>, %46, %cst_15 [0] : vector<16x1xf32> to vector<1xf32>
    %48 = vector.shape_cast %47 : vector<1xf32> to vector<1x1xf32>
    %49 = vector.shape_cast %48 : vector<1x1xf32> to vector<1x1x1xf32>
    %c0_16 = arith.constant 0 : index
    %c0_17 = arith.constant 0 : index
    %50 = vector.load %arg6[%c0_16, %c0_17] : memref<16x32xf32, #tpu.memory_space<vmem>>, vector<16x32xf32>
    %51 = arith.addf %50, %34 : vector<16x32xf32>
    %c0_18 = arith.constant 0 : index
    %c0_19 = arith.constant 0 : index
    %52 = vector.load %arg6[%c0_18, %c0_19] : memref<16x32xf32, #tpu.memory_space<vmem>>, vector<16x32xf32>
    tpu.vector_store %arg6[%c0_18, %c0_19], %51 {strides = array<i32>} : memref<16x32xf32, #tpu.memory_space<vmem>>, vector<16x32xf32>,
    %53 = arith.subf %12, %34 : vector<16x32xf32>
    %c0_20 = arith.constant 0 : index
    %c0_21 = arith.constant 0 : index
    %54 = vector.load %arg10[%c0_20, %c0_21] : memref<16x32xf32, #tpu.memory_space<vmem>>, vector<16x32xf32>
    tpu.vector_store %arg10[%c0_20, %c0_21], %53 {strides = array<i32>} : memref<16x32xf32, #tpu.memory_space<vmem>>, vector<16x32xf32>,
    %55 = tpu.iota {dimensions = array<i32: 1>} : vector<16x3xi32>
    %56 = vector.broadcast %arg1 : i32 to vector<16x3xi32>
    %57 = arith.cmpi eq, %55, %56 : vector<16x3xi32>
    %c0_22 = arith.constant 0 : index
    %c0_23 = arith.constant 0 : index
    %58 = vector.load %arg8[%c0_22, %c0_23] : memref<16x3xi32, #tpu.memory_space<vmem>>, vector<16x3xi32>
    %59 = vector.shape_cast %29 : vector<16x1xi32> to vector<16x1xi32>
    %60 = vector.broadcast %59 : vector<16x1xi32> to vector<16x3xi32>
    %61 = arith.select %57, %60, %58 : vector<16x3xi1>, vector<16x3xi32>
    %c0_24 = arith.constant 0 : index
    %c0_25 = arith.constant 0 : index
    %62 = vector.load %arg8[%c0_24, %c0_25] : memref<16x3xi32, #tpu.memory_space<vmem>>, vector<16x3xi32>
    tpu.vector_store %arg8[%c0_24, %c0_25], %61 {strides = array<i32>} : memref<16x3xi32, #tpu.memory_space<vmem>>, vector<16x3xi32>,
    %63 = tpu.iota {dimensions = array<i32: 2>} : vector<1x1x3xi32>
    %64 = vector.broadcast %arg1 : i32 to vector<1x1x3xi32>
    %65 = arith.cmpi eq, %63, %64 : vector<1x1x3xi32>
    %c0_26 = arith.constant 0 : index
    %c0_27 = arith.constant 0 : index
    %c0_28 = arith.constant 0 : index
    %66 = vector.load %arg7[%c0_26, %c0_27, %c0_28] : memref<1x1x3xf32, #tpu.memory_space<vmem>>, vector<1x1x3xf32>
    %67 = vector.shape_cast %49 : vector<1x1x1xf32> to vector<1x1x1xf32>
    %68 = vector.broadcast %67 : vector<1x1x1xf32> to vector<1x1x3xf32>
    %69 = arith.select %65, %68, %66 : vector<1x1x3xi1>, vector<1x1x3xf32>
    %c0_29 = arith.constant 0 : index
    %c0_30 = arith.constant 0 : index
    %c0_31 = arith.constant 0 : index
    %70 = vector.load %arg7[%c0_29, %c0_30, %c0_31] : memref<1x1x3xf32, #tpu.memory_space<vmem>>, vector<1x1x3xf32>
    tpu.vector_store %arg7[%c0_29, %c0_30, %c0_31], %69 {strides = array<i32>} : memref<1x1x3xf32, #tpu.memory_space<vmem>>, vector<1x1x3xf32>,
    %c0_32 = arith.constant 0 : index
    %c0_33 = arith.constant 0 : index
    %71 = vector.load %arg9[%c0_32, %c0_33] : memref<16x128xf32, #tpu.memory_space<vmem>>, vector<16x128xf32>
    tpu.vector_store %arg9[%c0_32, %c0_33], %20 {strides = array<i32>} : memref<16x128xf32, #tpu.memory_space<vmem>>, vector<16x128xf32>,
    return
  }
  func.func @transform_0(%arg0: i32, %arg1: i32) -> (i32, i32) {
    %c0_i32 = arith.constant 0 : i32
    %c0_i32_0 = arith.constant 0 : i32
    return %arg0, %c0_i32 : i32, i32
  }
  func.func @transform_1(%arg0: i32, %arg1: i32) -> (i32, i32, i32) {
    %c0_i32 = arith.constant 0 : i32
    %c0_i32_0 = arith.constant 0 : i32
    %c0_i32_1 = arith.constant 0 : i32
    %c0_i32_2 = arith.constant 0 : i32
    return %c0_i32, %c0_i32_0, %c0_i32_1 : i32, i32, i32
  }
  func.func @transform_2(%arg0: i32, %arg1: i32) -> (i32, i32, i32) {
    %c0_i32 = arith.constant 0 : i32
    %c0_i32_0 = arith.constant 0 : i32
    %c0_i32_1 = arith.constant 0 : i32
    %c0_i32_2 = arith.constant 0 : i32
    return %c0_i32, %c0_i32_0, %c0_i32_1 : i32, i32, i32
  }
  func.func @transform_3(%arg0: i32, %arg1: i32) -> (i32, i32, i32) {
    %c0_i32 = arith.constant 0 : i32
    %c0_i32_0 = arith.constant 0 : i32
    %c0_i32_1 = arith.constant 0 : i32
    %c0_i32_2 = arith.constant 0 : i32
    return %c0_i32, %c0_i32_0, %c0_i32_1 : i32, i32, i32
  }
  func.func @transform_4(%arg0: i32, %arg1: i32) -> (i32, i32) {
    %c0_i32 = arith.constant 0 : i32
    %c0_i32_0 = arith.constant 0 : i32
    return %arg0, %c0_i32 : i32, i32
  }
  func.func @transform_5(%arg0: i32, %arg1: i32) -> (i32, i32, i32) {
    %c0_i32 = arith.constant 0 : i32
    %c0_i32_0 = arith.constant 0 : i32
    %c0_i32_1 = arith.constant 0 : i32
    return %arg0, %c0_i32, %c0_i32_0 : i32, i32, i32
  }
  func.func @transform_6(%arg0: i32, %arg1: i32) -> (i32, i32) {
    %c0_i32 = arith.constant 0 : i32
    %c0_i32_0 = arith.constant 0 : i32
    return %arg0, %c0_i32 : i32, i32
  }
  func.func @transform_7(%arg0: i32, %arg1: i32) -> (i32, i32) {
    %c0_i32 = arith.constant 0 : i32
    return %arg0, %arg1 : i32, i32
  }
}

</mosaic_0001>

<bundles_post_ra>
// kernel: tpu_custom_call.1
= control target key start
LH: loop header
LB: loop body
LE: loop exit
PB: predicated region body
PF: predicated region fallthrough
CT: control target
= control target key end

     0   :  { %s1485_s0 = inlined_call_operand.vmem [shape: f32[16,32], index: 0, kind: input, shape index: {}]   ;;  %s1486_s1 = inlined_call_operand.vmem [shape: f32[3,32,128], index: 1, kind: input, shape index: {}]   ;;  %s1487_s2 = inlined_call_operand.vmem [shape: f32[3,128,32], index: 2, kind: input, shape index: {}]   ;;  %s1488_s3 = inlined_call_operand.vmem [shape: f32[3,1,128], index: 3, kind: input, shape index: {}]   ;;  %s1489_s4 = inlined_call_operand.hbm [shape: f32[16,32], index: 4, kind: output, shape index: {0}]   ;;  %s1490_s5 = inlined_call_operand.hbm [shape: f32[1,1,3], index: 5, kind: output, shape index: {1}]   ;;  %s1491_s6 = inlined_call_operand.vmem [shape: s32[16,3], index: 6, kind: output, shape index: {2}]   ;;  %s1492_s7 = inlined_call_operand.hbm [shape: f32[16,384], index: 7, kind: output, shape index: {3}]  }
   0x1   :  { %1494 = sst [smem:[#allocation11_spill]] %s1485_s0 }
   0x2   :  { %1495 = sst [smem:[#allocation12_spill]] %s1486_s1 }
   0x3   :  { %13 = vsyncpa [#allocation4], 0 }
   0x4   :  { %14 = vsyncpa [#allocation6], 0  ;;  %s1209_s24 = smov 0   ;;  %s1211_s25 = smov 0  }
   0x5   :  { %s1213_s26 = smov 0   ;;  %s1215_s27 = smov 0  }
   0x6   :  { %s1217_s28 = smov 0   ;;  %s1219_s29 = smov 0  }
   0x7 LB: > { %s809_s30 = sadd.s32 4294967295, %s1158_s29   ;;  %s1493_s8 = sadd.s32 4294967294, %s1158_s29   ;;  %s1158_s29 = sphi %s1219_s29, %s20_s29   ;;  %s1154_s28 = sphi %s1217_s28, %s1508_s28   ;;  %s1150_s27 = sphi %s1215_s27, %s1507_s27   ;;  %s1146_s26 = sphi %s1213_s26, %s1506_s26   ;;  %s1142_s25 = sphi %s1211_s25, %s1505_s25   ;;  %s1138_s24 = sphi %s1209_s24, %s1504_s24  }
   0x8   : > { %s29_s9 = sadd.s32 1, %s1154_s28  ;;  %s208_s10 = sadd.s32 1, %s1146_s26 }
   0x9   : > { %p30_p0 = scmp.ge.s32.totalorder %s29_s9, 3  ;;  %p218_p1 = scmp.ne.s32.totalorder %s1146_s26, %s1142_s25 }
   0xa   : > { %p1245_p2 = scmp.eq.s32.totalorder %s809_s30, 2  ;;  %p224_p3 = scmp.ne.s32.totalorder %s1142_s25, %s1138_s24 }
   0xb   : > { %s1510_s9 = smov (%p30_p0, %s29_s9), 0  ;;  %p225_p5 = scmp.eq.s32.totalorder %s1493_s8, 2 }
   0xc   : > { %p1254_p4 = por %p1245_p2, %p218_p1  ;;  %s204_s13 = ssub.s32 %s1154_s28, %s1510_s9 }
   0xd   : > { %p813_p6 = scmp.ge.s32.totalorder %s1158_s29, 1  ;;  %p206_p7 = scmp.eq.s32.totalorder %s204_s13, 0 }
   0xe   : > { %p1263_p8 = por %p225_p5, %p224_p3  ;;  %p261_p9 = scmp.lt.s32.totalorder %s1158_s29, 4 }
   0xf   : > { %s1269_s15 = scalar_select %p206_p7, %s1146_s26, %s208_s10  }
  0x10   : > { %p262_p10 = pnand %p813_p6, %p261_p9 }
  0x11   : > { %s295_s16 = sand.u32 (!%p262_p10), 1, %s1142_s25   ;;  %p815_p11 = scmp.ne.s32.totalorder (!%p262_p10), %s1150_s27, 0 }
  0x12   : > { %265 = sbr.rel (%p262_p10) target bundleno = 1101 (0x44d), region = 36  ;;  %s814_s17 = sshll.u32 (!%p262_p10), %s295_s16, 4 }
  0x13   : > { %s1272_s18 = scalar_lea.vmem (!%p262_p10), [#allocation7], %s814_s17 }
  0x19   : > { %315 = sbr.rel (%p815_p11) target bundleno = 33 (0x21), region = 40  ;;  %s1499_s0 = sld [smem:[#allocation11_spill]] (!%p815_p11)  ;;  %vm318_vm0 = vcmask (!%p815_p11), 261120   ;;  %vm323_vm1 = vcmask (!%p815_p11), 23552   ;;  %v1160_v2 = vmov (!%p815_p11), 0.0   ;;  %v1161_v3 = vmov (!%p815_p11), 0  }
  0x1a   : > { %321 = vst.msk [vmem:[#allocation3] sm:$0xff] (!%p815_p11), %vm318_vm0, %v1160_v2  ;;  %322 = vst.msk [vmem:[#allocation3 + $0x8] sm:$0xff] (!%p815_p11), %vm318_vm0, %v1160_v2  ;;  %vm326_vm2 = vcmask (!%p815_p11), 16384  }
  0x1b   : > { %324 = vst.msk [vmem:[%s1491_s6] sm:$0xff] (!%p815_p11), %vm323_vm1, %v1161_v3  ;;  %325 = vst.msk [vmem:[%s1491_s6 + $0x8] sm:$0xff] (!%p815_p11), %vm323_vm1, %v1161_v3 }
  0x1c   : > { %327 = vst.msk [vmem:[#allocation5] sm:$0x1] (!%p815_p11), %vm326_vm2, %v1160_v2 }
  0x1f   : > { %v316_v0 = vld [vmem:[%s1499_s0] sm:$0xff] (!%p815_p11)  ;;  %v317_v1 = vld [vmem:[%s1499_s0 + $0x8] sm:$0xff] (!%p815_p11) }
  0x20   : > { %319 = vst.msk [vmem:[#allocation2] sm:$0xff] %vm318_vm0, %v316_v0  ;;  %320 = vst.msk [vmem:[#allocation2 + $0x8] sm:$0xff] %vm318_vm0, %v317_v1 }
  0x21 PF: > { %s816_s16 = sshll.u32 %s1150_s27, 5  ;;  %vm358_vm3 = vcmask 261120   ;;  %s1500_s1 = sld [smem:[#allocation12_spill]]  ;;  %v460_v25 = vlaneseq  ;;  %vm619_vm9 = vcmask 23552  }
  0x22   : > { %s352_s23 = scalar_lea.vmem %s1488_s3, %s1150_s27  ;;  %s817_s24 = sshll.u32 %s1150_s27, 7 }
  0x23   : > { %v820_v17 = vld [vmem:[%s352_s23] ss:$0 sm:$0xff]  ;;  %v1311_v26 = vand.u32 127, %v460_v25 }
  0x27   : > { %v1288_v4 = vld [vmem:[#allocation2] sm:$0xff]  ;;  %v1290_v5 = vld [vmem:[#allocation2 + $0x8] sm:$0xff]  ;;  %s329_s20 = scalar_lea.vmem %s1500_s1, %s816_s16  ;;  %s1321_s16 = scalar_lea.vmem %s1487_s2, %s817_s24 }
  0x28   : > { %867 = vmatprep.mubr.msk.f32.mxu0 %vm358_vm3, %v1288_v4  ;;  %v356_v6 = vmul.f32 %v1288_v4, %v1288_v4  ;;  %v357_v7 = vmul.f32 %v1290_v5, %v1290_v5  ;;  %v330_v8 = vld [vmem:[%s329_s20] sm:$0xff]  ;;  %v331_v9 = vld [vmem:[%s329_s20 + $0x8] sm:$0xff]  ;;  %v332_v10 = vld [vmem:[%s329_s20 + $0x10] sm:$0xff] }
  0x29   : > { %v905_v11 = vpack.c.bf16 %v331_v9, %v330_v8  ;;  %v333_v12 = vld [vmem:[%s329_s20 + $0x18] sm:$0xff]  ;;  %v336_v35 = vld [vmem:[%s1321_s16] sm:$0xff]  ;;  %v337_v36 = vld [vmem:[%s1321_s16 + $0x8] sm:$0xff] }
  0x2a   : > { %v359_v13 = vsel %vm358_vm3, %v356_v6, 0.0  ;;  %v909_v14 = vpack.c.bf16 %v333_v12, %v332_v10  ;;  %v362_v15 = vsel %vm358_vm3, %v357_v7, 0.0  ;;  %v338_v37 = vld [vmem:[%s1321_s16 + $0x10] sm:$0xff]  ;;  %v913_v38 = vpack.c.bf16 %v337_v36, %v336_v35  ;;  %v339_v39 = vld [vmem:[%s1321_s16 + $0x18] sm:$0xff]  ;;  %v340_v41 = vld [vmem:[%s1321_s16 + $0x20] sm:$0xff] }
  0x2b   : > { %360 = vadd.xlane.f32.xlu0 %v359_v13  ;;  %906 = vmatprep.subr.bf16.mxu0 %v905_v11  ;;  %v917_v40 = vpack.c.bf16 %v339_v39, %v338_v37  ;;  %v341_v42 = vld [vmem:[%s1321_s16 + $0x28] sm:$0xff]  ;;  %v342_v44 = vld [vmem:[%s1321_s16 + $0x30] sm:$0xff]  ;;  %v343_v45 = vld [vmem:[%s1321_s16 + $0x38] sm:$0xff]  ;;  %v613_v6 = vstv %s1150_s27 }
  0x2c   : > { %908 = vmatpush3.bf16.msra.mxu0 %v905_v11  ;;  %914 = vmatprep.subr.bf16.mxu1 %v913_v38  ;;  %v921_v43 = vpack.c.bf16 %v341_v42, %v340_v41  ;;  %v925_v46 = vpack.c.bf16 %v343_v45, %v342_v44  ;;  %v344_v47 = vld [vmem:[%s1321_s16 + $0x40] sm:$0xff]  ;;  %v345_v48 = vld [vmem:[%s1321_s16 + $0x48] sm:$0xff]  ;;  %v346_v50 = vld [vmem:[%s1321_s16 + $0x50] sm:$0xff]  ;;  %vm1341_vm8 = vcmp.eq.s32.totalorder %v1311_v26, %v613_v6 }
  0x2d   : > { %910 = vmatprep.subr.bf16.mxu0 %v909_v14  ;;  %916 = vmatpush3.bf16.msra.mxu1 %v913_v38  ;;  %v929_v49 = vpack.c.bf16 %v345_v48, %v344_v47  ;;  %v347_v51 = vld [vmem:[%s1321_s16 + $0x58] sm:$0xff]  ;;  %v348_v61 = vld [vmem:[%s1321_s16 + $0x60] sm:$0xff]  ;;  %v349_v62 = vld [vmem:[%s1321_s16 + $0x68] sm:$0xff] }
  0x2e   : > { %918 = vmatprep.subr.bf16.mxu1 %v917_v40  ;;  %v933_v52 = vpack.c.bf16 %v347_v51, %v346_v50  ;;  %v937_v63 = vpack.c.bf16 %v349_v62, %v348_v61  ;;  %v350_v0 = vld [vmem:[%s1321_s16 + $0x70] sm:$0xff]  ;;  %v351_v1 = vld [vmem:[%s1321_s16 + $0x78] sm:$0xff]  ;;  %v615_v12 = vld [vmem:[%s1491_s6] sm:$0xff]  ;;  %s1163_s16 = smov [#allocation3]  }
  0x2f   : > { %363 = vadd.xlane.f32.xlu0 %v362_v15  ;;  %v941_v2 = vpack.c.bf16 %v351_v1, %v350_v0  ;;  %s647_s17 = sshll.u32 %s1163_s16, 4  ;;  %s648_s17 = int_to_ptr.vmem [resolvable:$true] %s647_s17 }
  0x30   : > { %912 = vmatpush3.bf16.msra.mxu0 %v909_v14  ;;  %s1020_s19 = scalar_lea.vmem %s648_s17, 256  ;;  %p1027_p1 = scmp.lt.s32.totalorder %s648_s17, %s648_s17 }
  0x31   : > { %920 = vmatpush3.bf16.msra.mxu1 %v917_v40  ;;  %p1021_p12 = scmp.ne.s32.totalorder %s648_s17, %s1020_s19  ;;  %p1028_p3 = scmp.lt.s32.totalorder %s1020_s19, %s1020_s19 }
  0x32   : > { %922 = vmatprep.subr.bf16.mxu1 %v921_v43 }
  0x33   : > { %868 = vmatmul.mubr.msk.f32.vlgmr.msra.gmra.mrb[0].mxu0 %vm358_vm3, %v1290_v5  ;;  %p1022_p13 = pnand %p1021_p12, %p1245_p2  ;;  %p1029_p5 = por %p1028_p3, %p1027_p1 }
  0x35   : > { %924 = vmatpush3.bf16.msra.mxu1 %v921_v43  ;;  %p1023_p0 = pneg %p1022_p13 }
  0x36   : > { %926 = vmatprep.subr.bf16.mxu1 %v925_v46 }
  0x37   : > { %p1030_p6 = pnand %p1029_p5, %p1023_p0 }
  0x39   : > { %928 = vmatpush3.bf16.msra.mxu1 %v925_v46 }
  0x3a   : > { %930 = vmatprep.subr.bf16.mxu1 %v929_v49 }
  0x3d   : > { %932 = vmatpush3.bf16.msra.mxu1 %v929_v49 }
  0x3e   : > { %934 = vmatprep.subr.bf16.mxu1 %v933_v52 }
  0x41   : > { %936 = vmatpush3.bf16.msra.mxu1 %v933_v52 }
  0x42   : > { %938 = vmatprep.subr.bf16.mxu1 %v937_v63 }
  0x45   : > { %940 = vmatpush3.bf16.msra.mxu1 %v937_v63 }
  0x46   : > { %942 = vmatprep.subr.bf16.mxu1 %v941_v2 }
  0x49   : > { %944 = vmatpush3.bf16.msra.mxu1 %v941_v2 }
  0xb8   : > { %v361_v16 = vpop.xlane.xlu0 %360 }
  0xb9   : > { %v452_v20 = vadd.f32 %v820_v17, %v361_v16 }
  0xbc   : > { %v364_v18 = vpop.xlane.xlu0 %363 }
  0xbd   : > { %v453_v19 = vadd.f32 %v820_v17, %v364_v18  ;;  %v1162_v18 = vmov 1.0  }
 0x106   : > { %v869_v21 = vpop.f32.mrb[0].mxu0 }
 0x107   : > { %v455_v22 = vadd.f32 %v869_v21, %v453_v19  ;;  %v437_v23 = vpop.f32.mrb[1].mxu0  ;;  %v616_v19 = vld [vmem:[%s1491_s6 + $0x8] sm:$0xff] }
 0x108   : > { %v454_v24 = vadd.f32 %v452_v20, %v437_v23  ;;  %v603_v23 = vld [vmem:[#allocation3] sm:$0xff] }
 0x109   : > { %627 = vst [vmem:[%s1272_s18 + $0x8] sm:$0xff] %v455_v22 }
 0x10a   : > { %626 = vst [vmem:[%s1272_s18] sm:$0xff] %v454_v24  ;;  %456 = vmin.xlane.f32.xlu1 %v454_v24 }
 0x10e   : > { %458 = vmin.xlane.f32.xlu1 %v455_v22 }
 0x197   : > { %v457_v27 = vpop.xlane.xlu1 %456 }
 0x198   : > { %vm462_vm4 = vcmp.eq.f32.partialorder %v454_v24, %v457_v27 }
 0x199   : > { %v464_v28 = vsel %vm462_vm4, %v1311_v26, 128 }
 0x19a   : > { %v467_v29 = vshra.s32 %v464_v28, 16  ;;  %v466_v53 = vand.u32 65535, %v464_v28 }
 0x19b   : > { %v459_v30 = vpop.xlane.xlu1 %458 }
 0x19c   : > { %vm463_vm5 = vcmp.eq.f32.partialorder %v455_v22, %v459_v30  ;;  %v469_v31 = vcvt.s32.f32 %v467_v29  ;;  %v468_v56 = vcvt.s32.f32 %v466_v53  ;;  %v604_v22 = vld [vmem:[#allocation3 + $0x8] sm:$0xff] }
 0x19d   : > { %v465_v32 = vsel %vm463_vm5, %v1311_v26, 128 }
 0x19e   : > { %470 = vmin.xlane.f32.xlu0 %v469_v31  ;;  %v481_v33 = vshra.s32 %v465_v32, 16  ;;  %v480_v54 = vand.u32 65535, %v465_v32 }
 0x1a0   : > { %v483_v34 = vcvt.s32.f32 %v481_v33  ;;  %v482_v59 = vcvt.s32.f32 %v480_v54 }
 0x1a2   : > { %484 = vmin.xlane.f32.xlu1 %v483_v34 }
 0x22b   : > { %v471_v55 = vpop.xlane.xlu0 %470 }
 0x22c   : > { %vm472_vm6 = vcmp.eq.f32.partialorder %v469_v31, %v471_v55  ;;  %v477_v3 = vcvt.f32.s32 %v471_v55 }
 0x22d   : > { %v473_v57 = vsel %vm472_vm6, %v468_v56, inf }
 0x22e   : > { %474 = vmin.xlane.f32.xlu0 %v473_v57  ;;  %v478_v8 = vshll.u32 %v477_v3, 16 }
 0x22f   : > { %v485_v58 = vpop.xlane.xlu1 %484 }
 0x230   : > { %vm486_vm7 = vcmp.eq.f32.partialorder %v483_v34, %v485_v58  ;;  %v491_v9 = vcvt.f32.s32 %v485_v58 }
 0x231   : > { %v487_v60 = vsel %vm486_vm7, %v482_v59, inf }
 0x232   : > { %488 = vmin.xlane.f32.xlu1 %v487_v60  ;;  %v492_v15 = vshll.u32 %v491_v9, 16 }
 0x2bb   : > { %v475_v7 = vpop.xlane.xlu0 %474 }
 0x2bc   : > { %v476_v10 = vcvt.f32.s32 %v475_v7 }
 0x2be   : > { %v479_v13 = vadd.s32 %v478_v8, %v476_v10 }
 0x2bf   : > { %v489_v14 = vpop.xlane.xlu1 %488 }
 0x2c0   : > { %v490_v16 = vcvt.f32.s32 %v489_v14  ;;  %vm494_vm10 = vcmp.eq.s32.totalorder %v1311_v26, %v479_v13  ;;  %v617_v17 = vsel %vm1341_vm8, %v479_v13, %v615_v12 }
 0x2c1   : > { %902 = vmatprep.mubr.msk.f32.mxu1 %vm494_vm10, %v1162_v18  ;;  %620 = vst.msk [vmem:[%s1491_s6] sm:$0xff] %vm619_vm9, %v617_v17 }
 0x2c2   : > { %v493_v20 = vadd.s32 %v492_v15, %v490_v16 }
 0x2c4   : > { %vm495_vm11 = vcmp.eq.s32.totalorder %v1311_v26, %v493_v20  ;;  %v618_v21 = vsel %vm1341_vm8, %v493_v20, %v616_v19 }
 0x2c5   : > { %903 = vmatmul.mubr.msk.f32.vlgmr.msra.gmra.mrb[0].mxu1 %vm495_vm11, %v1162_v18  ;;  %621 = vst.msk [vmem:[%s1491_s6 + $0x8] sm:$0xff] %vm619_vm9, %v618_v21 }
 0x398   : > { %v904_v24 = vpop.f32.mrb[0].mxu1 }
 0x399   : > { %v606_v25 = vadd.f32 %v904_v24, %v604_v22  ;;  %v610_v27 = vsub.f32 %v1290_v5, %v904_v24  ;;  %v566_v28 = vpop.f32.mrb[1].mxu1  ;;  %v576_v29 = vsub.f32 %v904_v24, %v1290_v5 }
 0x39a   : > { %v575_v30 = vsub.f32 %v566_v28, %v1288_v4  ;;  %v605_v26 = vadd.f32 %v603_v23, %v566_v28  ;;  %v609_v31 = vsub.f32 %v1288_v4, %v566_v28 }
 0x39b   : > { %612 = vst.msk [vmem:[#allocation2 + $0x8] sm:$0xff] %vm358_vm3, %v610_v27  ;;  %608 = vst.msk [vmem:[#allocation3 + $0x8] sm:$0xff] %vm358_vm3, %v606_v25  ;;  %v578_v32 = vmul.f32 %v576_v29, %v576_v29 }
 0x39c   : > { %v577_v33 = vmul.f32 %v575_v30, %v575_v30  ;;  %607 = vst.msk [vmem:[#allocation3] sm:$0xff] %vm358_vm3, %v605_v26  ;;  %611 = vst.msk [vmem:[#allocation2] sm:$0xff] %vm358_vm3, %v609_v31 }
 0x39d   : > { %v582_v34 = vsel %vm358_vm3, %v578_v32, 0.0 }
 0x39e   : > { %583 = vadd.xlane.f32.xlu1 %v582_v34  ;;  %v579_v5 = vsel %vm358_vm3, %v577_v33, 0.0 }
 0x39f   : > { %580 = vadd.xlane.f32.xlu0 %v579_v5 }
 0x3a0   : > { %1033 = shalt.err (!%p1030_p6)
}
 0x3a1   : > { %s1034_s22 = scalar_lea.hbm %s1489_s4, 256 }
 0x3a2   : > { %p1035_p7 = scmp.ne.s32.totalorder %s1489_s4, %s1034_s22  ;;  %p1040_p11 = scmp.lt.u32.totalorder %s1034_s22, %s1489_s4 }
 0x3a4   : > { %p1036_p9 = pnand %p1035_p7, %p1245_p2 }
 0x3a6   : > { %p1037_p10 = pneg %p1036_p9 }
 0x3a8   : > { %p1042_p12 = pnand %p1040_p11, %p1037_p10 }
 0x3aa   : > { %1045 = shalt.err (!%p1042_p12)
}
 0x3ab   : > { %s1164_s19 = smov 128   ;;  %s1165_s20 = smov 8  }
 0x3ac   : > { %946 = dma.vmem_to_hbm [thread:$0]  (%p1245_p2), %s648_s17, 256, %s1489_s4, [#allocation4], %s1164_s19, %s1164_s19, %s1165_s20  }
 0x3ad   : > { %s1396_s10 = sand.u32 1, %s809_s30   ;;  %s1403_s16 = scalar_lea.hbm %s1492_s7, %s817_s24 }
 0x3ae   : > { %s682_s8 = sshll.u32 %s1272_s18, 4  ;;  %s634_s0 = scalar_lea.sflag [#allocation4], %s1396_s10  ;;  %s1406_s8 = int_to_ptr.vmem [resolvable:$true] %s682_s8 }
 0x3af   : > { %s1046_s1 = scalar_lea.vmem %s1406_s8, 256  ;;  %s1166_s30 = smov [#allocation7]  }
 0x3b0   : > { %p1047_p13 = scmp.ne.s32.totalorder %s1406_s8, %s1046_s1  ;;  %s1050_s27 = sshll.u32 %s1166_s30, 4  ;;  %s1051_s27 = int_to_ptr.vmem [resolvable:$false] %s1050_s27 }
 0x3b1   : > { %s1052_s17 = scalar_lea.vmem %s1051_s27, 512  ;;  %p1053_p3 = scmp.lt.s32.totalorder %s1406_s8, %s1051_s27 }
 0x3b2   : > { %p1048_p0 = pnand %p1047_p13, %p1254_p4  ;;  %p1054_p5 = scmp.lt.s32.totalorder %s1052_s17, %s1046_s1 }
 0x3b4   : > { %p1049_p1 = pneg %p1048_p0  ;;  %p1055_p6 = por %p1054_p5, %p1053_p3 }
 0x3b6   : > { %p1056_p7 = pnand %p1055_p6, %p1049_p1 }
 0x3b8   : > { %1059 = shalt.err (!%p1056_p7)
}
 0x3b9   : > { %s1060_s18 = scalar_lea.hbm %s1403_s16, 256  ;;  %s1064_s23 = scalar_lea.hbm %s1492_s7, 768 }
 0x3ba   : > { %p1061_p9 = scmp.ne.s32.totalorder %s1403_s16, %s1060_s18  ;;  %p1065_p12 = scmp.lt.u32.totalorder %s1403_s16, %s1492_s7 }
 0x3bb   : > { %p1066_p13 = scmp.lt.u32.totalorder %s1064_s23, %s1060_s18  ;;  %p1068_p1 = scmp.lt.u32.totalorder %s1060_s18, %s1403_s16 }
 0x3bc   : > { %p1062_p10 = pnand %p1061_p9, %p1254_p4 }
 0x3bd   : > { %p1067_p0 = por %p1066_p13, %p1065_p12 }
 0x3be   : > { %p1063_p11 = pneg %p1062_p10 }
 0x3bf   : > { %p1069_p3 = por %p1068_p1, %p1067_p0 }
 0x3c1   : > { %p1070_p5 = pnand %p1069_p3, %p1063_p11 }
 0x3c3   : > { %1073 = shalt.err (!%p1070_p5)
}
 0x3c4   : > { %s1167_s1 = smov 384   ;;  %s1168_s30 = smov [#allocation5]   ;;  %v622_v42 = vld [vmem:[#allocation5] sm:$0x1]  ;;  %vm624_vm12 = vcmask 16384  }
 0x3c5   : > { %949 = dma.vmem_to_hbm [thread:$0]  (%p1254_p4), %s1406_s8, 256, %s1403_s16, %s634_s0, %s1164_s19, %s1167_s1, %s1165_s20  }
 0x3c6   : > { %s663_s27 = sshll.u32 %s1168_s30, 4  ;;  %s664_s27 = int_to_ptr.vmem [resolvable:$true] %s663_s27 }
 0x3c7   : > { %s1074_s0 = scalar_lea.vmem %s664_s27, 16  ;;  %s1080_s8 = scalar_lea.vmem %s664_s27, 32 }
 0x3c8   : > { %p1075_p4 = scmp.ne.s32.totalorder %s664_s27, %s1074_s0  ;;  %p1081_p9 = scmp.lt.s32.totalorder %s664_s27, %s664_s27 }
 0x3c9   : > { %p1082_p10 = scmp.lt.s32.totalorder %s1080_s8, %s1074_s0 }
 0x3ca   : > { %p1076_p6 = pnand %p1075_p4, %p1245_p2 }
 0x3cb   : > { %p1083_p11 = por %p1082_p10, %p1081_p9 }
 0x3cc   : > { %p1077_p7 = pneg %p1076_p6 }
 0x3ce   : > { %p1084_p12 = pnand %p1083_p11, %p1077_p7 }
 0x42b   : > { %v584_v4 = vpop.xlane.xlu1 %583 }
 0x42c   : > { %v581_v35 = vpop.xlane.xlu0 %580 }
 0x42d   : > { %v596_v36 = vadd.f32 %v584_v4, %v581_v35 }
 0x42f   : > { %v597_v37 = vrot.slane %v596_v36, 4 }
 0x431   : > { %v598_v38 = vadd.f32 %v597_v37, %v596_v36 }
 0x433   : > { %v599_v39 = vrot.slane %v598_v38, 2 }
 0x435   : > { %v600_v40 = vadd.f32 %v599_v39, %v598_v38 }
 0x437   : > { %v601_v41 = vrot.slane %v600_v40, 1 }
 0x439   : > { %v602_v43 = vadd.f32 %v601_v41, %v600_v40 }
 0x43b   : > { %v623_v44 = vsel %vm1341_vm8, %v602_v43, %v622_v42 }
 0x43c   : > { %625 = vst.msk [vmem:[#allocation5] sm:$0x1] %vm624_vm12, %v623_v44 }
 0x43d   : > { %1087 = shalt.err (!%p1084_p12)
}
 0x43e   : > { %s1088_s20 = scalar_lea.hbm %s1490_s5, 16 }
 0x43f   : > { %p1089_p13 = scmp.ne.s32.totalorder %s1490_s5, %s1088_s20  ;;  %p1094_p3 = scmp.lt.u32.totalorder %s1088_s20, %s1490_s5 }
 0x441   : > { %p1090_p0 = pnand %p1089_p13, %p1245_p2 }
 0x443   : > { %p1091_p1 = pneg %p1090_p0 }
 0x445   : > { %p1096_p5 = pnand %p1094_p3, %p1091_p1 }
 0x447   : > { %1099 = shalt.err (!%p1096_p5)
}
 0x448   : > { %948 = dma.vmem_to_hbm [thread:$0]  (%p1245_p2), %s664_s27, 16, %s1490_s5, [#allocation6]  }
 0x449   : > { %1125 = dma.done.wait (%p1245_p2), [#allocation4], 256  }
 0x44a   : > { %1127 = vsyncadd (%p1245_p2), [#allocation4], 4294967040 }
 0x44b   : > { %1129 = dma.done.wait (%p1245_p2), [#allocation6], 16  }
 0x44c   : > { %1131 = vsyncadd (%p1245_p2), [#allocation6], 4294967280 }
 0x44d PF: > { %p963_p4 = scmp.ge.s32.totalorder %s1158_s29, 2  ;;  %s1503_s23 = sadd.s32 4294967294, %s1158_s29  }
 0x44e   : > { %s713_s22 = sand.u32 1, %s1503_s23  }
 0x44f   : > { %p956_p6 = pnand %p963_p4, %p1263_p8  ;;  %s714_s13 = scalar_lea.sflag [#allocation4], %s713_s22 }
 0x451   : > { %1133 = dma.done.wait (!%p956_p6), %s714_s13, 256  }
 0x452   : > { %1135 = vsyncadd (!%p956_p6), %s714_s13, 4294967040  ;;  %s20_s29 = sadd.s32 1, %s1158_s29   ;;  %s1504_s24 = smov %s1142_s25 }
 0x453   : > { %p17_p7 = scmp.ge.s32.totalorder %s20_s29, 5   ;;  %s1505_s25 = smov %s1146_s26 }
 0x454   : > { %s1506_s26 = smov %s1269_s15  ;;  %s1507_s27 = smov %s1154_s28 }
 0x455   : > { %s1508_s28 = smov %s1510_s9  ;;  %19 = sbr.rel (!%p17_p7) target bundleno = 7 (0x7), region = 107 }
 0x45c   :  { %719 = vsyncpa [#allocation4], 1 }
 0x45d   :  { %721 = vsyncpa [#allocation4 + $0x1], 1 }
 0x45e   :  { %722 = vsyncpa [#allocation6], 1 }

</bundles_post_ra>
